<compile_context>
chip_gen: v7x
topology: tpu7x:2x2x1
jax: 0.10.0
libtpu: 0.0.40
codegen_flags: <defaults>
</compile_context>

<pallas_src>
import math

import jax
import jax.numpy as jnp
import numpy as np
from jax.experimental import pallas as pl
from jax.experimental.pallas import tpu as pltpu

_LANE = 128


# ----------------------------- Pallas kernel -----------------------------

def _drop_path_kernel(scale_ref, x_ref, o_ref):
    # scale_ref: (TB, 1)   per-sample scale (0.0 or 1/keep_prob)
    # x_ref/o_ref: (TB, TF)
    o_ref[...] = x_ref[...] * scale_ref[...]     # lane-broadcast multiply (VPU)


# ----------------------------- tiling helpers -----------------------------

def _round_up(x, m):
    return ((x + m - 1) // m) * m


def _sublane_multiple(dtype) -> int:
    """Packed sublane multiple: 8 for 4-byte, 16 for 2-byte, 32 for 1-byte dtypes."""
    itemsize = jnp.dtype(dtype).itemsize
    return max(8, 32 // max(itemsize, 1))


def _vmem_capacity_bytes() -> int:
    try:
        return int(pltpu.get_tpu_info().vmem_capacity_bytes)
    except Exception:
        return 128 << 20        # assume v5e/v6e-class VMEM if query unavailable


def _row_split_factor(B, F, sub):
    """Factor G (128*G divides F) such that the free reshape (B,F)->(B*G,F//G)
    makes the row axis a multiple of `sub`.  Returns 1 when none exists."""
    if B % sub == 0 or F % _LANE != 0:
        return 1
    m = F // _LANE
    for g in range(2, m + 1):
        if m % g == 0 and (B * g) % sub == 0:
            return g
    return 1


def _tile_plan(B, F, dtype):
    """Pick (TB, TF, grid, vmem_limit_bytes) from a dtype/generation byte budget."""
    itemsize = jnp.dtype(dtype).itemsize
    sub = _sublane_multiple(dtype)
    vmem = _vmem_capacity_bytes()
    small_vmem = vmem <= (64 << 20)          # 64-MiB-VMEM / 2-TensorCore generation
    tile_budget = (6 << 20) if small_vmem else (4 << 20)
    # 4x tile (double-buffered in + out) + tiny scale buffers stays well under
    # this; 48 MiB leaves ~25% headroom on a 64 MiB VMEM and is trivial on 128 MiB.
    vmem_limit = 48 << 20

    # Aligned block shapes; unaligned array dims get masked tail blocks via cdiv
    # grids instead of one giant (VMEM-busting) full-dim block.
    f_align = _LANE if F >= _LANE else F
    b_align = sub if B >= sub else (8 if B >= 8 else B)
    b_pad = _round_up(B, b_align)
    f_pad = _round_up(F, f_align)

    # Moderate row tile, then grow the lane-dense feature tile to the budget;
    # if F is exhausted first (small-F / small-B case) grow rows instead.
    tb = min(b_pad, _round_up(256, b_align))
    tf = max(f_align, (tile_budget // max(tb * itemsize, 1)) // f_align * f_align)
    tf = min(tf, f_pad)
    if tf == f_pad and tb * tf * itemsize < tile_budget:
        tb_want = (tile_budget // max(tf * itemsize, 1)) // b_align * b_align
        tb = min(b_pad, max(tb, tb_want, b_align))

    grid = (pl.cdiv(B, tb), pl.cdiv(F, tf))

    # On the 2-TensorCore generation make sure a sizable single-block grid still
    # has >=2 "parallel" steps so both cores' DMA paths stream.
    if (small_vmem and grid[0] * grid[1] == 1
            and tf >= 2 * _LANE and tb * tf * itemsize >= (2 << 20)):
        tf = _round_up(pl.cdiv(tf, 2), _LANE)
        grid = (pl.cdiv(B, tb), pl.cdiv(F, tf))

    return tb, tf, grid, vmem_limit


# ----------------------------- pallas wrapper -----------------------------

def drop_path_scale_pallas(x, scale, *, donate_x=False):
    """out[b, ...] = x[b, ...] * scale[b]  (scale already = mask / keep_prob)."""
    B = x.shape[0]
    F = math.prod(x.shape[1:]) if x.ndim > 1 else 1
    dtype = x.dtype
    sub = _sublane_multiple(dtype)

    # Small / unaligned batch: free row-major re-flatten to (B*G, F//G) so the
    # sublane axis is packed; the per-sample scale is repeated G times (tiny).
    g = _row_split_factor(B, F, sub)
    B_eff, F_eff = B * g, F // g

    x2d = x.reshape(B_eff, F_eff)                       # row-major flatten: free view
    scale2d = scale.astype(dtype).reshape(B, 1)
    if g > 1:
        scale2d = jnp.repeat(scale2d, g, axis=0)

    TB, TF, grid, vmem_limit = _tile_plan(B_eff, F_eff, dtype)

    out = pl.pallas_call(
        _drop_path_kernel,
        out_shape=jax.ShapeDtypeStruct((B_eff, F_eff), dtype),
        grid=grid,
        in_specs=[
            # Per-sample scale; block index constant across j -> re-DMA elided.
            pl.BlockSpec((TB, 1), lambda i, j: (i, 0)),
            pl.BlockSpec((TB, TF), lambda i, j: (i, j)),   # activation tile
        ],
        out_specs=pl.BlockSpec((TB, TF), lambda i, j: (i, j)),
        compiler_params=pltpu.CompilerParams(
            dimension_semantics=("parallel", "parallel"),
            vmem_limit_bytes=vmem_limit),
        # Optional in-place update when the caller donates x (x2d is input 1).
        input_output_aliases=({1: 0} if donate_x else {}),
    )(scale2d, x2d)
    return out.reshape(x.shape)


# ----------------------------- module wrapper -----------------------------

def drop_path(x, key, drop_prob: float = 0.0, training: bool = False):
    """JAX/Pallas equivalent of torch drop_path (DropPath.forward)."""
    if drop_prob == 0.0 or not training:
        return x                                   # identity, same as torch early return
    keep_prob = 1.0 - drop_prob
    B = x.shape[0]
    # Per-sample Bernoulli(keep_prob) mask = floor(keep_prob + U[0,1)).  The
    # uniform draw / scale are computed in f32 (robust for bf16 / fp8
    # activations) and cast to x.dtype inside the Pallas wrapper.
    random_tensor = jnp.floor(keep_prob + jax.random.uniform(key, (B,), dtype=jnp.float32))
    scale = random_tensor / keep_prob              # 0.0 (dropped) or 1/keep_prob (kept)
    return drop_path_scale_pallas(x, scale)


# ----------------------------- main -----------------------------

if __name__ == "__main__":
    B, C, H, W = 2, 4, 16, 16
    drop_prob = 0.25

    key = jax.random.PRNGKey(0)
    kx, kmask = jax.random.split(key)
    x = jax.random.normal(kx, (B, C, H, W), dtype=jnp.float32)

    # training=True path exercises the Pallas kernel.
    y = drop_path(x, kmask, drop_prob=drop_prob, training=True)
    y = jax.block_until_ready(y)

    # Pure-JAX reference with the identical per-sample mask.
    keep_prob = 1.0 - drop_prob
    random_tensor = jnp.floor(keep_prob + jax.random.uniform(kmask, (B,), dtype=jnp.float32))
    y_ref = x * (random_tensor / keep_prob).reshape(B, 1, 1, 1)
    np.testing.assert_allclose(np.asarray(y), np.asarray(y_ref), rtol=1e-6, atol=1e-6)

    # eval / drop_prob=0 path must be the identity (matches torch early return).
    y_eval = drop_path(x, kmask, drop_prob=drop_prob, training=False)
    np.testing.assert_allclose(np.asarray(y_eval), np.asarray(x))
    y_p0 = drop_path(x, kmask, drop_prob=0.0, training=True)
    np.testing.assert_allclose(np.asarray(y_p0), np.asarray(x))

    print("KERNEL_OK")
</pallas_src>

<mosaic_0001>
module attributes {stable_mosaic.version = 11 : i64} {
  func.func @_drop_path_kernel(%arg0: i32, %arg1: i32, %arg2: memref<8x1xf32, #tpu.memory_space<vmem>>, %arg3: memref<8x256xf32, #tpu.memory_space<vmem>>, %arg4: memref<8x256xf32, #tpu.memory_space<vmem>>) attributes {dimension_semantics = [#tpu.dimension_semantics<parallel>, #tpu.dimension_semantics<parallel>], iteration_bounds = array<i64: 1, 1>, scalar_prefetch = 0 : i64, scratch_operands = 0 : i64, tpu.core_type = #tpu.core_type<tc>, window_params = [{transform_indices = @transform_0, window_bounds = array<i64: 8, 1>}, {transform_indices = @transform_1, window_bounds = array<i64: 8, 256>}, {transform_indices = @transform_2, window_bounds = array<i64: 8, 256>}]} {
    %c0 = arith.constant 0 : index
    %c0_0 = arith.constant 0 : index
    %0 = vector.load %arg3[%c0, %c0_0] : memref<8x256xf32, #tpu.memory_space<vmem>>, vector<8x256xf32>
    %c0_1 = arith.constant 0 : index
    %c0_2 = arith.constant 0 : index
    %1 = vector.load %arg2[%c0_1, %c0_2] : memref<8x1xf32, #tpu.memory_space<vmem>>, vector<8x1xf32>
    %2 = vector.broadcast %1 : vector<8x1xf32> to vector<8x256xf32>
    %3 = arith.mulf %0, %2 : vector<8x256xf32>
    %c0_3 = arith.constant 0 : index
    %c0_4 = arith.constant 0 : index
    %4 = vector.load %arg4[%c0_3, %c0_4] : memref<8x256xf32, #tpu.memory_space<vmem>>, vector<8x256xf32>
    tpu.vector_store %arg4[%c0_3, %c0_4], %3 {strides = array<i32>} : memref<8x256xf32, #tpu.memory_space<vmem>>, vector<8x256xf32>,
    return
  }
  func.func @transform_0(%arg0: i32, %arg1: i32) -> (i32, i32) {
    %c0_i32 = arith.constant 0 : i32
    %c0_i32_0 = arith.constant 0 : i32
    return %arg0, %c0_i32 : i32, i32
  }
  func.func @transform_1(%arg0: i32, %arg1: i32) -> (i32, i32) {
    %c0_i32 = arith.constant 0 : i32
    return %arg0, %arg1 : i32, i32
  }
  func.func @transform_2(%arg0: i32, %arg1: i32) -> (i32, i32) {
    %c0_i32 = arith.constant 0 : i32
    return %arg0, %arg1 : i32, i32
  }
}

</mosaic_0001>

<bundles_post_ra>
// kernel: tpu_custom_call.1
= control target key start
LH: loop header
LB: loop body
LE: loop exit
PB: predicated region body
PF: predicated region fallthrough
CT: control target
= control target key end

     0   :  { %7 = vsyncpa [#allocation3], 0  ;;  %s148_s0 = inlined_call_operand.vmem [shape: f32[8,1], index: 0, kind: input, shape index: {}]   ;;  %s149_s1 = inlined_call_operand.hbm [shape: f32[8,256], index: 1, kind: input, shape index: {}]   ;;  %s150_s2 = inlined_call_operand.hbm [shape: f32[8,256], index: 2, kind: output, shape index: {}]  }
   0x1   :  { %8 = vsyncpa [#allocation4], 0  ;;  %s103_s9 = smov [#allocation2]   ;;  %s55_s13 = scalar_lea.hbm %s149_s1, 256 }
   0x2   :  { %s17_s10 = sshll.u32 %s103_s9, 4  ;;  %p56_p0 = scmp.ne.s32.totalorder %s149_s1, %s55_s13  ;;  %s18_s10 = int_to_ptr.vmem [resolvable:$true] %s17_s10 }
   0x3   :  { %p59_p1 = scmp.lt.u32.totalorder %s55_s13, %s149_s1 }
   0x5   :  { %p61_p2 = pnand %p59_p1, %p56_p0 }
   0x7   :  { %64 = shalt.err (!%p61_p2)
}
   0x8   :  { %s65_s18 = scalar_lea.vmem %s18_s10, 256  ;;  %p70_p4 = scmp.lt.s32.totalorder %s18_s10, %s18_s10 }
   0x9   :  { %p66_p3 = scmp.ne.s32.totalorder %s18_s10, %s65_s18  ;;  %p71_p5 = scmp.lt.s32.totalorder %s65_s18, %s65_s18 }
   0xb   :  { %p72_p6 = por %p71_p5, %p70_p4 }
   0xd   :  { %p73_p7 = pnand %p72_p6, %p66_p3 }
   0xf   :  { %76 = shalt.err (!%p73_p7)
}
  0x10   :  { %20 = dma.hbm_to_vmem [thread:$0]  %s149_s1, 256, %s18_s10, [#allocation3]  }
  0x11   :  { %99 = dma.done.wait [#allocation3], 256  }
  0x12   :  { %100 = vsyncadd [#allocation3], 4294967040  ;;  %v104_v0 = vmov 0   ;;  %v26_v1 = vld [vmem:[%s148_s0] sm:$0xff]  ;;  %v25_v3 = vld [vmem:[#allocation2 + $0x8] sm:$0xff]  ;;  %s105_s23 = smov [#allocation5]  }
  0x13   :  { %54 = vset.pattern.permute.xlu0 %v104_v0  ;;  %v24_v2 = vld [vmem:[#allocation2] sm:$0xff]  ;;  %s42_s24 = sshll.u32 %s105_s23, 4  ;;  %s43_s24 = int_to_ptr.vmem [resolvable:$true] %s42_s24 }
  0x14   :  { %29 = vperm.xlu0 %54, %v26_v1   ;;  %s77_s1 = scalar_lea.vmem %s43_s24, 256  ;;  %p82_p9 = scmp.lt.s32.totalorder %s43_s24, %s43_s24 }
  0x15   :  { %p78_p8 = scmp.ne.s32.totalorder %s43_s24, %s77_s1  ;;  %p83_p10 = scmp.lt.s32.totalorder %s77_s1, %s77_s1 }
  0x17   :  { %p84_p11 = por %p83_p10, %p82_p9 }
  0x19   :  { %p85_p12 = pnand %p84_p11, %p78_p8 }
  0x93   :  { %v30_v4 = vpop.permute.xlu0 %29 }
  0x94   :  { %v32_v5 = vmul.f32 %v30_v4, %v24_v2  ;;  %v33_v6 = vmul.f32 %v30_v4, %v25_v3 }
  0x96   :  { %34 = vst [vmem:[#allocation5] sm:$0xff] %v32_v5  ;;  %35 = vst [vmem:[#allocation5 + $0x8] sm:$0xff] %v33_v6 }
  0x97   :  { %88 = shalt.err (!%p85_p12)
}
  0x98   :  { %s89_s26 = scalar_lea.hbm %s150_s2, 256 }
  0x99   :  { %p90_p13 = scmp.ne.s32.totalorder %s150_s2, %s89_s26  ;;  %p93_p0 = scmp.lt.u32.totalorder %s89_s26, %s150_s2 }
  0x9b   :  { %p95_p1 = pnand %p93_p0, %p90_p13 }
  0x9d   :  { %98 = shalt.err (!%p95_p1)
}
  0x9e   :  { %45 = dma.vmem_to_hbm [thread:$0]  %s43_s24, 256, %s150_s2, [#allocation4]  }
  0x9f   :  { %101 = dma.done.wait [#allocation4], 256  }
  0xa0   :  { %102 = vsyncadd [#allocation4], 4294967040 }
  0xa1   :  { %49 = vsyncpa [#allocation3], 1 }
  0xa2   :  { %50 = vsyncpa [#allocation4], 1 }

</bundles_post_ra>
